<compile_context>
chip_gen: v5e
topology: v5e:2x2
jax: 0.10.0
libtpu: 0.0.40
codegen_flags: <defaults>
</compile_context>

<pallas_src>
import jax
import jax.numpy as jnp
from jax.experimental import pallas as pl
from jax.experimental.pallas import tpu as pltpu

VARIANCE = 1.0                        # RBF signal variance
LENGTHSCALE = 1.0                     # RBF lengthscale
GAMMA = -0.5 / (LENGTHSCALE ** 2)     # folded RBF exponent scale


def _rbf(a, b):
    """Plain-JAX RBF k(a, b); used only for tiny [M, M] glue and the reference."""
    sq = (jnp.sum(a * a, axis=1)[:, None] + jnp.sum(b * b, axis=1)[None, :]
          - 2.0 * (a @ b.T))
    return VARIANCE * jnp.exp(GAMMA * jnp.maximum(sq, 0.0))


def _round_up(x, m):
    return ((x + m - 1) // m) * m


# ---------------------------------------------------------------------------
# Fused Pallas kernel (transposed / lane-dense layout):
#   RBF cross-covariance + variational conditional + reparameterized sample.
# ---------------------------------------------------------------------------
def _fused_layer_body(x_ref, zs_ref, z2_ref, vt_ref, c2t_ref, linv_ref,
                      eps_ref, out_ref):
    f32 = jnp.float32
    d_out = vt_ref.shape[0]
    m = linv_ref.shape[0]
    mxu_dtype = zs_ref.dtype          # f32 by default; bf16 on v6e/v7x opt-in

    # --- kfu^T = k(Z, X_tile): [m, tn]; tile/row axis is lane-minor ----------
    x = x_ref[...]                                                # [d_in, tn]
    x2 = GAMMA * jnp.sum(x * x, axis=0, keepdims=True)            # [1, tn]
    cross = jnp.dot(zs_ref[...], x.astype(mxu_dtype),
                    preferred_element_type=f32)                   # (-2G)*Z@X
    scaled = jnp.minimum(x2 + z2_ref[...] + cross, 0.0)           # G*max(sq,0)
    kfu = jnp.exp(scaled)                                         # [m, tn]
    if VARIANCE != 1.0:                                           # folded away
        kfu = VARIANCE * kfu
    kfu_m = kfu.astype(mxu_dtype)

    # --- mean^T = (Ku^{-1} q_mu)^T @ kfu  (zero mean function) ---------------
    mean = jnp.dot(vt_ref[...], kfu_m, preferred_element_type=f32)   # [D, tn]

    # --- delta[d, n] = ||C_d^T kfu_n||^2 - ||Lu^{-1} kfu_n||^2 ---------------
    # One wide lane-dense MXU matmul over all D outputs; the group-sum over m
    # is a reshape + XLU reduction (no selector matmul, no extra operand).
    g = jnp.dot(c2t_ref[...], kfu_m, preferred_element_type=f32)     # [D*m, tn]
    h = jnp.dot(linv_ref[...], kfu_m, preferred_element_type=f32)    # [m, tn]
    gg = g * g
    pos = jnp.sum(gg.reshape(d_out, m, gg.shape[-1]), axis=1)        # [D, tn]
    hsum = jnp.sum(h * h, axis=0, keepdims=True)                     # [1, tn]

    # Kff diagonal of a stationary RBF kernel is the constant signal variance.
    covar = VARIANCE + (pos - hsum)                                  # [D, tn]
    std = jnp.sqrt(jnp.maximum(covar, 0.0))                          # guard
    samples = mean + eps_ref[...] * std

    # Packed [3*D, tn] output slab; every store is full lane width now.
    out_ref[0:d_out, :] = mean
    out_ref[d_out:2 * d_out, :] = covar
    out_ref[2 * d_out:3 * d_out, :] = samples


def layer_forward(inputs, inducing_points, q_mu, q_covar, eps, *,
                  tile_n=1024, use_bf16_mxu=False):
    """Forward pass of Layer.

    inputs: [S, N, Din], inducing_points: [M, Din], q_mu: [M, D],
    q_covar: [D, M, M] lower-triangular factors, eps: [S, N, D] std normal.
    Returns (samples, means, covars), each [S, N, D].
    """
    s, n, d_in = inputs.shape
    m, d_out = q_mu.shape
    sn = s * n
    f32 = jnp.float32
    mxu_dtype = jnp.bfloat16 if use_bf16_mxu else f32

    # Transposed (lane-dense) row streams: rows on the lane axis.
    x_t = inputs.reshape(sn, d_in).astype(f32).T          # [d_in, SN]
    eps_t = eps.reshape(sn, d_out).astype(f32).T          # [d_out, SN]
    z = inducing_points.astype(f32)
    q_mu = q_mu.astype(f32)
    q_covar = q_covar.astype(f32)

    # ---- small [M, M] glue: factorizations / solves (no Pallas equivalent) --
    # TODO(synk): cholesky / triangular solves stay in plain JAX.
    ku = _rbf(z, z) + jnp.eye(m, dtype=f32)               # Ku = k(Z, Z) + I
    lu = jnp.linalg.cholesky(ku)                          # Lu
    v = jax.scipy.linalg.cho_solve((lu, True), q_mu)      # Ku^{-1} q_mu  [M, D]
    # c2[:, d*M + k] = (Ku^{-1} q_covar[d])[:, k]                        [M, D*M]
    qc_cols = jnp.transpose(q_covar, (1, 0, 2)).reshape(m, d_out * m)
    c2 = jax.scipy.linalg.cho_solve((lu, True), qc_cols)
    linv = jax.scipy.linalg.solve_triangular(
        lu, jnp.eye(m, dtype=f32), lower=True)            # Lu^{-1}       [M, M]

    # Grid-invariant operands (tiny; at production M*D mark pipeline_mode=
    # pl.Buffered(1) and tile c2t over D on an extra "arbitrary" axis).
    zs = ((-2.0 * GAMMA) * z).astype(mxu_dtype)                       # [M, Din]
    z2c = (GAMMA * jnp.sum(z * z, axis=1, keepdims=True)).astype(f32)  # [M, 1]
    vt = v.T.astype(mxu_dtype)                                        # [D, M]
    c2t = c2.T.astype(mxu_dtype)                                      # [D*M, M]
    linv = linv.astype(mxu_dtype)                                     # [M, M]

    # ---- row tiling: tile axis is lane-minor -> multiples of 128 ------------
    tile_n = max(128, min(_round_up(tile_n, 128), _round_up(sn, 128)))
    num_tiles = pl.cdiv(sn, tile_n)
    sn_pad = num_tiles * tile_n
    if sn_pad != sn:
        x_t = jnp.pad(x_t, ((0, 0), (0, sn_pad - sn)))
        eps_t = jnp.pad(eps_t, ((0, 0), (0, sn_pad - sn)))

    inv = lambda i: (0, 0)   # grid-invariant operands
    packed = pl.pallas_call(
        _fused_layer_body,
        out_shape=jax.ShapeDtypeStruct((3 * d_out, sn_pad), f32),
        grid=(num_tiles,),
        in_specs=[
            pl.BlockSpec((d_in, tile_n), lambda i: (0, i)),   # X tile (transposed)
            pl.BlockSpec((m, d_in), inv),                     # (-2*GAMMA) * Z
            pl.BlockSpec((m, 1), inv),                        # GAMMA * |Z|^2
            pl.BlockSpec((d_out, m), inv),                    # (Ku^{-1} q_mu)^T
            pl.BlockSpec((d_out * m, m), inv),                # stacked C_d^T
            pl.BlockSpec((m, m), inv),                        # Lu^{-1}
            pl.BlockSpec((d_out, tile_n), lambda i: (0, i)),  # eps tile (transposed)
        ],
        out_specs=pl.BlockSpec((3 * d_out, tile_n), lambda i: (0, i)),
        compiler_params=pltpu.CompilerParams(
            dimension_semantics=("parallel",),      # shards across v7x's 2 TCs
            vmem_limit_bytes=16 * 1024 * 1024,      # right-sized (<64 MiB v7x)
        ),
    )(x_t, zs, z2c, vt, c2t, linv, eps_t)

    packed = packed[:, :sn]
    means = packed[0:d_out, :].T.reshape(s, n, d_out)
    covars = packed[d_out:2 * d_out, :].T.reshape(s, n, d_out)
    samples = packed[2 * d_out:3 * d_out, :].T.reshape(s, n, d_out)
    return samples, means, covars


# ---------------------------------------------------------------------------
# Reference (plain JAX) for a correctness check of the Pallas path.
# ---------------------------------------------------------------------------
def _reference_forward(inputs, z, q_mu, q_covar, eps):
    s, n, d_in = inputs.shape
    m, d_out = q_mu.shape
    x = inputs.reshape(s * n, d_in)

    ku = _rbf(z, z) + jnp.eye(m, dtype=jnp.float32)
    lu = jnp.linalg.cholesky(ku)
    kuf = _rbf(z, x)                                            # [M, SN]
    a = jax.scipy.linalg.cho_solve((lu, True), kuf)             # Ku^{-1} Kuf
    mean = a.T @ q_mu                                           # [SN, D]
    sk = jnp.einsum('dij,dkj->dik', q_covar, q_covar) - ku[None]
    b = jnp.einsum('dmk,kn->dmn', sk, a)
    delta = jnp.sum(a[None] * b, axis=1)                        # [D, SN]
    covar = (VARIANCE + delta).T                                # [SN, D]
    samples = mean + eps.reshape(s * n, d_out) * jnp.sqrt(jnp.maximum(covar, 0.0))
    return (samples.reshape(s, n, d_out),
            mean.reshape(s, n, d_out),
            covar.reshape(s, n, d_out))


if __name__ == "__main__":
    S, N, D_IN = 2, 100, 3          # inputs [S, N, Din]  -> SN = 200 rows
    M, D_OUT = 16, 4                # num_inducing, output_dims

    key = jax.random.PRNGKey(0)
    k_x, k_z, k_mu, k_cov, k_eps = jax.random.split(key, 5)

    inputs = jax.random.normal(k_x, (S, N, D_IN), dtype=jnp.float32)
    inducing_points = jax.random.normal(k_z, (M, D_IN), dtype=jnp.float32)

    # Torch init is q_mu = zeros, covar{idx} = cholesky(k(Z,Z) + I); perturb a
    # little so both the mean and delta-covariance paths are exercised.
    q_mu = 0.1 * jax.random.normal(k_mu, (M, D_OUT), dtype=jnp.float32)
    lu0 = jnp.linalg.cholesky(_rbf(inducing_points, inducing_points)
                              + jnp.eye(M, dtype=jnp.float32))
    q_covar = lu0[None] + 0.1 * jnp.tril(
        jax.random.normal(k_cov, (D_OUT, M, M), dtype=jnp.float32))

    eps = jax.random.normal(k_eps, (S, N, D_OUT), dtype=jnp.float32)

    # tile_n=128 here so the small demo still exercises a multi-step grid and a
    # padded remainder tile (SN=200 -> 2 tiles of 128). Production default 1024.
    samples, means, covars = jax.block_until_ready(
        layer_forward(inputs, inducing_points, q_mu, q_covar, eps, tile_n=128))

    ref_s, ref_m, ref_c = _reference_forward(inputs, inducing_points, q_mu,
                                             q_covar, eps)
    assert means.shape == (S, N, D_OUT)
    assert jnp.allclose(means, ref_m, atol=2e-3, rtol=2e-3), \
        float(jnp.max(jnp.abs(means - ref_m)))
    assert jnp.allclose(covars, ref_c, atol=2e-3, rtol=2e-3), \
        float(jnp.max(jnp.abs(covars - ref_c)))
    assert jnp.allclose(samples, ref_s, atol=2e-3, rtol=2e-3), \
        float(jnp.max(jnp.abs(samples - ref_s)))

    print("KERNEL_OK")
</pallas_src>

<mosaic_0001>
module attributes {stable_mosaic.version = 11 : i64} {
  func.func @_fused_layer_body(%arg0: i32, %arg1: memref<3x128xf32, #tpu.memory_space<vmem>>, %arg2: memref<16x3xf32, #tpu.memory_space<vmem>>, %arg3: memref<16x1xf32, #tpu.memory_space<vmem>>, %arg4: memref<4x16xf32, #tpu.memory_space<vmem>>, %arg5: memref<64x16xf32, #tpu.memory_space<vmem>>, %arg6: memref<16x16xf32, #tpu.memory_space<vmem>>, %arg7: memref<4x128xf32, #tpu.memory_space<vmem>>, %arg8: memref<12x128xf32, #tpu.memory_space<vmem>>) attributes {dimension_semantics = [#tpu.dimension_semantics<parallel>], iteration_bounds = array<i64: 2>, scalar_prefetch = 0 : i64, scratch_operands = 0 : i64, tpu.core_type = #tpu.core_type<tc>, window_params = [{transform_indices = @transform_0, window_bounds = array<i64: 3, 128>}, {pipeline_mode = #tpu.pipeline_mode<synchronous>, transform_indices = @transform_1, window_bounds = array<i64: 16, 3>}, {pipeline_mode = #tpu.pipeline_mode<synchronous>, transform_indices = @transform_2, window_bounds = array<i64: 16, 1>}, {pipeline_mode = #tpu.pipeline_mode<synchronous>, transform_indices = @transform_3, window_bounds = array<i64: 4, 16>}, {pipeline_mode = #tpu.pipeline_mode<synchronous>, transform_indices = @transform_4, window_bounds = array<i64: 64, 16>}, {pipeline_mode = #tpu.pipeline_mode<synchronous>, transform_indices = @transform_5, window_bounds = array<i64: 16, 16>}, {transform_indices = @transform_6, window_bounds = array<i64: 4, 128>}, {transform_indices = @transform_7, window_bounds = array<i64: 12, 128>}]} {
    %c0 = arith.constant 0 : index
    %c0_0 = arith.constant 0 : index
    %0 = vector.load %arg1[%c0, %c0_0] : memref<3x128xf32, #tpu.memory_space<vmem>>, vector<3x128xf32>
    %1 = arith.mulf %0, %0 : vector<3x128xf32>
    %cst = arith.constant dense<0.000000e+00> : vector<128xf32>
    %2 = vector.multi_reduction <add>, %1, %cst [0] : vector<3x128xf32> to vector<128xf32>
    %3 = vector.shape_cast %2 : vector<128xf32> to vector<1x128xf32>
    %cst_1 = arith.constant -5.000000e-01 : f32
    %4 = vector.broadcast %cst_1 : f32 to vector<1x128xf32>
    %5 = arith.mulf %4, %3 : vector<1x128xf32>
    %c0_2 = arith.constant 0 : index
    %c0_3 = arith.constant 0 : index
    %6 = vector.load %arg2[%c0_2, %c0_3] : memref<16x3xf32, #tpu.memory_space<vmem>>, vector<16x3xf32>
    %cst_4 = arith.constant dense<0.000000e+00> : vector<16x128xf32>
    %7 = tpu.matmul %6, %0, %cst_4 {dimension_numbers = #tpu.dot_dimension_numbers<[1], [0], [0], [1], [0, 0, 1, 1], [], []>} : vector<16x3xf32>, vector<3x128xf32>, vector<16x128xf32> -> vector<16x128xf32>
    %c0_5 = arith.constant 0 : index
    %c0_6 = arith.constant 0 : index
    %8 = vector.load %arg3[%c0_5, %c0_6] : memref<16x1xf32, #tpu.memory_space<vmem>>, vector<16x1xf32>
    %9 = vector.broadcast %5 : vector<1x128xf32> to vector<16x128xf32>
    %10 = vector.broadcast %8 : vector<16x1xf32> to vector<16x128xf32>
    %11 = arith.addf %9, %10 : vector<16x128xf32>
    %12 = arith.addf %11, %7 : vector<16x128xf32>
    %cst_7 = arith.constant 0.000000e+00 : f32
    %13 = vector.broadcast %cst_7 : f32 to vector<16x128xf32>
    %14 = arith.minimumf %12, %13 : vector<16x128xf32>
    %15 = math.exp %14 : vector<16x128xf32>
    %c0_8 = arith.constant 0 : index
    %c0_9 = arith.constant 0 : index
    %16 = vector.load %arg4[%c0_8, %c0_9] : memref<4x16xf32, #tpu.memory_space<vmem>>, vector<4x16xf32>
    %cst_10 = arith.constant dense<0.000000e+00> : vector<4x128xf32>
    %17 = tpu.matmul %16, %15, %cst_10 {dimension_numbers = #tpu.dot_dimension_numbers<[1], [0], [0], [1], [0, 0, 1, 1], [], []>} : vector<4x16xf32>, vector<16x128xf32>, vector<4x128xf32> -> vector<4x128xf32>
    %c0_11 = arith.constant 0 : index
    %c0_12 = arith.constant 0 : index
    %18 = vector.load %arg5[%c0_11, %c0_12] : memref<64x16xf32, #tpu.memory_space<vmem>>, vector<64x16xf32>
    %cst_13 = arith.constant dense<0.000000e+00> : vector<64x128xf32>
    %19 = tpu.matmul %18, %15, %cst_13 {dimension_numbers = #tpu.dot_dimension_numbers<[1], [0], [0], [1], [0, 0, 1, 1], [], []>} : vector<64x16xf32>, vector<16x128xf32>, vector<64x128xf32> -> vector<64x128xf32>
    %c0_14 = arith.constant 0 : index
    %c0_15 = arith.constant 0 : index
    %20 = vector.load %arg6[%c0_14, %c0_15] : memref<16x16xf32, #tpu.memory_space<vmem>>, vector<16x16xf32>
    %cst_16 = arith.constant dense<0.000000e+00> : vector<16x128xf32>
    %21 = tpu.matmul %20, %15, %cst_16 {dimension_numbers = #tpu.dot_dimension_numbers<[1], [0], [0], [1], [0, 0, 1, 1], [], []>} : vector<16x16xf32>, vector<16x128xf32>, vector<16x128xf32> -> vector<16x128xf32>
    %22 = arith.mulf %19, %19 : vector<64x128xf32>
    %23 = vector.shape_cast %22 : vector<64x128xf32> to vector<4x16x128xf32>
    %cst_17 = arith.constant dense<0.000000e+00> : vector<4x128xf32>
    %24 = vector.multi_reduction <add>, %23, %cst_17 [1] : vector<4x16x128xf32> to vector<4x128xf32>
    %25 = arith.mulf %21, %21 : vector<16x128xf32>
    %cst_18 = arith.constant dense<0.000000e+00> : vector<128xf32>
    %26 = vector.multi_reduction <add>, %25, %cst_18 [0] : vector<16x128xf32> to vector<128xf32>
    %27 = vector.shape_cast %26 : vector<128xf32> to vector<1x128xf32>
    %28 = vector.broadcast %27 : vector<1x128xf32> to vector<4x128xf32>
    %29 = arith.subf %24, %28 : vector<4x128xf32>
    %cst_19 = arith.constant 1.000000e+00 : f32
    %30 = vector.broadcast %cst_19 : f32 to vector<4x128xf32>
    %31 = arith.addf %30, %29 : vector<4x128xf32>
    %cst_20 = arith.constant 0.000000e+00 : f32
    %32 = vector.broadcast %cst_20 : f32 to vector<4x128xf32>
    %33 = arith.maximumf %31, %32 : vector<4x128xf32>
    %34 = math.sqrt %33 : vector<4x128xf32>
    %c0_21 = arith.constant 0 : index
    %c0_22 = arith.constant 0 : index
    %35 = vector.load %arg7[%c0_21, %c0_22] : memref<4x128xf32, #tpu.memory_space<vmem>>, vector<4x128xf32>
    %36 = arith.mulf %35, %34 : vector<4x128xf32>
    %37 = arith.addf %17, %36 : vector<4x128xf32>
    %c0_23 = arith.constant 0 : index
    %c0_24 = arith.constant 0 : index
    %38 = vector.load %arg8[%c0_23, %c0_24] : memref<12x128xf32, #tpu.memory_space<vmem>>, vector<4x128xf32>
    tpu.vector_store %arg8[%c0_23, %c0_24], %17 {strides = array<i32>} : memref<12x128xf32, #tpu.memory_space<vmem>>, vector<4x128xf32>,
    %c4 = arith.constant 4 : index
    %c0_25 = arith.constant 0 : index
    %39 = vector.load %arg8[%c4, %c0_25] : memref<12x128xf32, #tpu.memory_space<vmem>>, vector<4x128xf32>
    tpu.vector_store %arg8[%c4, %c0_25], %31 {strides = array<i32>} : memref<12x128xf32, #tpu.memory_space<vmem>>, vector<4x128xf32>,
    %c8 = arith.constant 8 : index
    %c0_26 = arith.constant 0 : index
    %40 = vector.load %arg8[%c8, %c0_26] : memref<12x128xf32, #tpu.memory_space<vmem>>, vector<4x128xf32>
    tpu.vector_store %arg8[%c8, %c0_26], %37 {strides = array<i32>} : memref<12x128xf32, #tpu.memory_space<vmem>>, vector<4x128xf32>,
    return
  }
  func.func @transform_0(%arg0: i32) -> (i32, i32) {
    %c0_i32 = arith.constant 0 : i32
    %c0_i32_0 = arith.constant 0 : i32
    return %c0_i32, %arg0 : i32, i32
  }
  func.func @transform_1(%arg0: i32) -> (i32, i32) {
    %c0_i32 = arith.constant 0 : i32
    %c0_i32_0 = arith.constant 0 : i32
    %c0_i32_1 = arith.constant 0 : i32
    return %c0_i32, %c0_i32_0 : i32, i32
  }
  func.func @transform_2(%arg0: i32) -> (i32, i32) {
    %c0_i32 = arith.constant 0 : i32
    %c0_i32_0 = arith.constant 0 : i32
    %c0_i32_1 = arith.constant 0 : i32
    return %c0_i32, %c0_i32_0 : i32, i32
  }
  func.func @transform_3(%arg0: i32) -> (i32, i32) {
    %c0_i32 = arith.constant 0 : i32
    %c0_i32_0 = arith.constant 0 : i32
    %c0_i32_1 = arith.constant 0 : i32
    return %c0_i32, %c0_i32_0 : i32, i32
  }
  func.func @transform_4(%arg0: i32) -> (i32, i32) {
    %c0_i32 = arith.constant 0 : i32
    %c0_i32_0 = arith.constant 0 : i32
    %c0_i32_1 = arith.constant 0 : i32
    return %c0_i32, %c0_i32_0 : i32, i32
  }
  func.func @transform_5(%arg0: i32) -> (i32, i32) {
    %c0_i32 = arith.constant 0 : i32
    %c0_i32_0 = arith.constant 0 : i32
    %c0_i32_1 = arith.constant 0 : i32
    return %c0_i32, %c0_i32_0 : i32, i32
  }
  func.func @transform_6(%arg0: i32) -> (i32, i32) {
    %c0_i32 = arith.constant 0 : i32
    %c0_i32_0 = arith.constant 0 : i32
    return %c0_i32, %arg0 : i32, i32
  }
  func.func @transform_7(%arg0: i32) -> (i32, i32) {
    %c0_i32 = arith.constant 0 : i32
    %c0_i32_0 = arith.constant 0 : i32
    return %c0_i32, %arg0 : i32, i32
  }
}

</mosaic_0001>

<bundles_post_ra>
// kernel: tpu_custom_call.1
= control target key start
LH: loop header
LB: loop body
LE: loop exit
PB: predicated region body
PF: predicated region fallthrough
CT: control target
= control target key end

     0   :  { %12 = vsyncpa [#allocation3], 0  ;;  %s1093_s0 = inlined_call_operand.vmem [shape: f32[3,256], index: 0, kind: input, shape index: {}]   ;;  %s1094_s1 = inlined_call_operand.vmem [shape: f32[16,3], index: 1, kind: input, shape index: {}]   ;;  %s1095_s2 = inlined_call_operand.vmem [shape: f32[16,1], index: 2, kind: input, shape index: {}]   ;;  %s1096_s3 = inlined_call_operand.vmem [shape: f32[4,16], index: 3, kind: input, shape index: {}]   ;;  %s1097_s4 = inlined_call_operand.vmem [shape: f32[64,16], index: 4, kind: input, shape index: {}]   ;;  %s1098_s5 = inlined_call_operand.vmem [shape: f32[16,16], index: 5, kind: input, shape index: {}]   ;;  %s1099_s6 = inlined_call_operand.vmem [shape: f32[4,256], index: 6, kind: input, shape index: {}]   ;;  %s1100_s7 = inlined_call_operand.hbm [shape: f32[12,256], index: 7, kind: output, shape index: {}]  }
   0x1   :  { %14 = vsyncpa [#allocation3 + $0x1], 0  ;;  %s904_s24 = smov 0   ;;  %s906_s25 = smov 0  }
   0x2   :  { %s908_s26 = smov 0   ;;  %s910_s27 = smov 0  }
   0x3 LB: > { %s925_s28 = sadd.s32 4294967295, %s858_s27   ;;  %s713_s29 = sadd.s32 4294967294, %s858_s27   ;;  %s858_s27 = sphi %s910_s27, %s1106_s27   ;;  %s854_s26 = sphi %s908_s26, %s1105_s26   ;;  %s850_s25 = sphi %s906_s25, %s1104_s25   ;;  %s846_s24 = sphi %s904_s24, %s1103_s24  }
   0x4   : > { %s929_s30 = sadd.s32 1, %s858_s27   ;;  %s184_s8 = sadd.s32 1, %s854_s26 }
   0x5   : > { %s181_s9 = ssub.s32 %s858_s27, %s929_s30  ;;  %p194_p0 = scmp.ne.s32.totalorder %s854_s26, %s850_s25 }
   0x6   : > { %p182_p1 = scmp.eq.s32.totalorder %s181_s9, 0  ;;  %p195_p2 = scmp.eq.s32.totalorder %s925_s28, 1 }
   0x7   : > { %p200_p3 = scmp.ne.s32.totalorder %s850_s25, %s846_s24  ;;  %p201_p4 = scmp.eq.s32.totalorder %s713_s29, 1 }
   0x8   : > { %s940_s10 = scalar_select %p182_p1, %s854_s26, %s184_s8  }
   0x9   : > { %p942_p5 = por %p195_p2, %p194_p0  ;;  %p946_p6 = por %p201_p4, %p200_p3 }
   0xa   : > { %p716_p7 = scmp.ge.s32.totalorder %s858_s27, 1  ;;  %p248_p8 = scmp.lt.s32.totalorder %s858_s27, 3 }
   0xc   : > { %p249_p9 = pnand %p716_p7, %p248_p8 }
   0xd   : > { %p283_p10 = scmp.lt.s32.totalorder (!%p249_p9), %s925_s28, 1  ;;  %s280_s29 = sand.u32 (!%p249_p9), 1, %s850_s25  }
   0xe   : > { %252 = sbr.rel (%p249_p9) target bundleno = 387 (0x183), region = 48  ;;  %s717_s8 = sshll.u32 (!%p249_p9), %s280_s29, 4 }
   0xf   : > { %s1023_s9 = scalar_lea.vmem (!%p249_p9), [#allocation2], %s717_s8  ;;  %s735_s13 = sshll.u32 (!%p249_p9), %s925_s28, 3 }
  0x10   : > { %s625_s21 = scalar_lea.sflag (!%p249_p9), [#allocation3], %s280_s29  ;;  %s816_s14 = scalar_lea.hbm (!%p249_p9), %s1100_s7, 32 }
  0x13   : > { %v338_v0 = vld [vmem:[%s1095_s2 + $0x8] sm:$0xff]  ;;  %v860_v1 = vmov 0   ;;  %s957_s15 = scalar_select %p283_p10, %s925_s28, 1  ;;  %vm293_vm0 = vcmask 1042432   ;;  %v302_v2 = vld [vmem:[%s1094_s1] sm:$0xff]  ;;  %vm304_vm1 = vcmask 23552  }
  0x14   : > { %783 = vset.pattern.permute.xlu0 %v860_v1  ;;  %v337_v5 = vld [vmem:[%s1095_s2] sm:$0xff]  ;;  %v303_v7 = vld [vmem:[%s1094_s1 + $0x8] sm:$0xff]  ;;  %vm360_vm2 = vcmask 130048   ;;  %v386_v36 = vld [vmem:[%s1097_s4 + $0x10] sm:$0xff]  ;;  %vm599_vm3 = vcmask 1041409   ;;  %vm602_vm4 = vcmask 1042434   ;;  %s635_s28 = scalar_lea.hbm %s1100_s7, %s735_s13 }
  0x15   : > { %346 = vperm.xlu0 %783, %v338_v0   ;;  %s718_s16 = sshll.u32 %s957_s15, 2  ;;  %v384_v29 = vld [vmem:[%s1097_s4] sm:$0xff]  ;;  %v385_v33 = vld [vmem:[%s1097_s4 + $0x8] sm:$0xff]  ;;  %v390_v37 = vld [vmem:[%s1097_s4 + $0x30] sm:$0xff]  ;;  %vm605_vm5 = vcmask 1043459   ;;  %s636_s15 = sshll.u32 %s1023_s9, 4  ;;  %s637_s15 = int_to_ptr.vmem [resolvable:$true] %s636_s15 }
  0x16   : > { %s286_s19 = scalar_lea.vmem %s1093_s0, %s718_s16  ;;  %v388_v30 = vld [vmem:[%s1097_s4 + $0x20] sm:$0xff]  ;;  %v389_v34 = vld [vmem:[%s1097_s4 + $0x28] sm:$0xff]  ;;  %v387_v38 = vld [vmem:[%s1097_s4 + $0x18] sm:$0xff]  ;;  %s290_s18 = scalar_lea.vmem %s1099_s6, %s718_s16 }
  0x17   : > { %v291_v3 = vld [vmem:[%s286_s19] sm:$0x7]  ;;  %v458_v35 = vld [vmem:[%s1098_s5 + $0x8] sm:$0xff]  ;;  %v391_v39 = vld [vmem:[%s1097_s4 + $0x38] sm:$0xff]  ;;  %s638_s16 = sshll.u32 %s635_s28, 4  ;;  %s639_s16 = int_to_ptr.hbm [resolvable:$true] %s638_s16 }
  0x18   : > { %v292_v4 = vmul.f32 %v291_v3, %v291_v3  ;;  %720 = vmatpush.msk.msra.mxu0 %vm293_vm0, %v291_v3  ;;  %v457_v31 = vld [vmem:[%s1098_s5] sm:$0xff]  ;;  %s810_s22 = sshra.s32 %s639_s16, 4  ;;  %s811_s22 = int_to_ptr.hbm [resolvable:$true] %s810_s22 }
  0x19   : > { %721 = vmatmul.msk.f32.vlgmr.msra.gmra.mxu0 %vm304_vm1, %v302_v2  ;;  %v359_v32 = vld [vmem:[%s1096_s3] sm:$0xf]  ;;  %s812_s23 = scalar_lea.hbm %s811_s22, 16  ;;  %p817_p0 = scmp.lt.s32.totalorder %s811_s22, %s1100_s7 }
  0x1a   : > { %v294_v6 = vsel %vm293_vm0, %v292_v4, 0.0  ;;  %p813_p11 = scmp.ne.s32.totalorder %s811_s22, %s812_s23  ;;  %p818_p1 = scmp.lt.s32.totalorder %s816_s14, %s812_s23 }
  0x1b   : > { %v295_v8 = vrot.slane %v294_v6, 4 }
  0x1c   : > { %p814_p12 = pnand %p813_p11, %p942_p5  ;;  %p819_p2 = por %p818_p1, %p817_p0 }
  0x1d   : > { %341 = vperm.xlu0 %783, %v337_v5   ;;  %v296_v9 = vadd.f32 %v295_v8, %v294_v6 }
  0x1e   : > { %p815_p13 = pneg %p814_p12 }
  0x1f   : > { %v297_v10 = vrot.slane %v296_v9, 2 }
  0x20   : > { %p820_p3 = pnand %p819_p2, %p815_p13 }
  0x21   : > { %722 = vmatmul.msk.f32.gmra.mxu0 %vm304_vm1, %v303_v7  ;;  %v298_v11 = vadd.f32 %v297_v10, %v296_v9 }
  0x23   : > { %v299_v13 = vrot.slane %v298_v11, 1 }
  0x25   : > { %v300_v14 = vadd.f32 %v299_v13, %v298_v11 }
  0x27   : > { %v301_v15 = vmul.f32 -0.5, %v300_v14 }
  0x87   : > { %v347_v12 = vpop.permute.xlu0 %346 }
  0x88   : > { %v350_v20 = vadd.f32 %v347_v12, %v301_v15 }
  0x8f   : > { %v342_v16 = vpop.permute.xlu0 %341 }
  0x90   : > { %v349_v18 = vadd.f32 %v342_v16, %v301_v15 }
  0x96   : > { %v331_v17 = vpop.f32.mrf.mxu0 }
  0x97   : > { %v351_v19 = vadd.f32 %v349_v18, %v331_v17 }
  0x99   : > { %v353_v22 = vmin.f32 %v351_v19, 0.0 }
  0x9b   : > { %v355_v25 = vmul.f32 1.442695, %v353_v22 }
  0x9e   : > { %v334_v21 = vpop.f32.mrf.mxu0 }
  0x9f   : > { %v352_v23 = vadd.f32 %v350_v20, %v334_v21 }
  0xa1   : > { %v354_v24 = vmin.f32 %v352_v23, 0.0 }
  0xa3   : > { %v357_v26 = vmul.f32 1.442695, %v354_v24 }
  0xa5   : > { %784 = vpow2.f32 %v357_v26 }
  0xa6   : > { %786 = vpow2.f32 %v355_v25 }
  0xab   : > { %v785_v27 = vpop.eup %784 }
  0xac   : > { %378 = vmatpush.msrb.mxu0 %v785_v27  ;;  %430 = vmatpush.msra.mxu1 %v785_v27  ;;  %v787_v28 = vpop.eup %786 }
  0xad   : > { %738 = vmatpush.msra.mxu2 %v785_v27  ;;  %479 = vmatpush.msra.mxu3 %v785_v27 }
  0xae   : > { %379 = vmatpush.msrb.mxu0 %v787_v28  ;;  %431 = vmatpush.msra.mxu1 %v787_v28 }
  0xaf   : > { %739 = vmatpush.msra.mxu2 %v787_v28  ;;  %480 = vmatpush.msra.mxu3 %v787_v28 }
  0xb0   : > { %724 = vmatmul.msk.f32.vlgmr.msra.gmra.mxu1 %vm360_vm2, %v384_v29  ;;  %728 = vmatmul.msk.f32.vlgmr.msra.gmra.mxu2 %vm360_vm2, %v388_v30 }
  0xb1   : > { %732 = vmatmul.msk.f32.vlgmr.msra.gmra.mxu3 %vm360_vm2, %v457_v31  ;;  %723 = vmatmul.msk.f32.vlgmr.msrb.gmra.mxu0 %vm360_vm2, %v359_v32 }
  0xb8   : > { %725 = vmatmul.msk.f32.gmra.mxu1 %vm360_vm2, %v385_v33  ;;  %729 = vmatmul.msk.f32.gmra.mxu2 %vm360_vm2, %v389_v34 }
  0xb9   : > { %733 = vmatmul.msk.f32.gmra.mxu3 %vm360_vm2, %v458_v35 }
  0xc0   : > { %726 = vmatmul.msk.f32.gmra.mxu1 %vm360_vm2, %v386_v36  ;;  %730 = vmatmul.msk.f32.gmra.mxu2 %vm360_vm2, %v390_v37 }
  0xc8   : > { %727 = vmatmul.msk.f32.gmra.mxu1 %vm360_vm2, %v387_v38  ;;  %731 = vmatmul.msk.f32.gmra.mxu2 %vm360_vm2, %v391_v39 }
 0x12d   : > { %v433_v40 = vpop.f32.mrf.mxu1 }
 0x12e   : > { %v488_v44 = vmul.f32 %v433_v40, %v433_v40  ;;  %v1021_v60 = vpop.f32.mrf.mxu0 }
 0x12f   : > { %610 = vst [vmem:[%s1023_s9] sm:$0xf] %v1021_v60 }
 0x133   : > { %v445_v41 = vpop.f32.mrf.mxu2 }
 0x134   : > { %v482_v42 = vpop.f32.mrf.mxu3  ;;  %v492_v50 = vmul.f32 %v445_v41, %v445_v41 }
 0x135   : > { %v436_v43 = vpop.f32.mrf.mxu1  ;;  %v524_v48 = vmul.f32 %v482_v42, %v482_v42 }
 0x136   : > { %v489_v45 = vmul.f32 %v436_v43, %v436_v43 }
 0x138   : > { %v496_v46 = vadd.f32 %v489_v45, %v488_v44 }
 0x13a   : > { %v497_v47 = vrot.slane %v496_v46, 4 }
 0x13b   : > { %v448_v49 = vpop.f32.mrf.mxu2 }
 0x13c   : > { %v498_v51 = vadd.f32 %v497_v47, %v496_v46  ;;  %v493_v52 = vmul.f32 %v448_v49, %v448_v49  ;;  %v485_v53 = vpop.f32.mrf.mxu3 }
 0x13d   : > { %v525_v54 = vmul.f32 %v485_v53, %v485_v53  ;;  %v439_v55 = vpop.f32.mrf.mxu1 }
 0x13e   : > { %v510_v56 = vadd.f32 %v493_v52, %v492_v50  ;;  %v499_v57 = vrot.slane %v498_v51, 2  ;;  %v490_v6 = vmul.f32 %v439_v55, %v439_v55 }
 0x13f   : > { %v526_v58 = vadd.f32 %v525_v54, %v524_v48 }
 0x140   : > { %v511_v59 = vrot.slane %v510_v56, 4  ;;  %v500_v63 = vadd.f32 %v499_v57, %v498_v51 }
 0x141   : > { %v527_v61 = vrot.slane %v526_v58, 4 }
 0x142   : > { %v512_v62 = vadd.f32 %v511_v59, %v510_v56  ;;  %v501_v8 = vrot.slane %v500_v63, 1 }
 0x143   : > { %v528_v0 = vadd.f32 %v527_v61, %v526_v58  ;;  %v451_v1 = vpop.f32.mrf.mxu2 }
 0x144   : > { %v513_v2 = vrot.slane %v512_v62, 2  ;;  %v502_v15 = vadd.f32 %v501_v8, %v500_v63  ;;  %v494_v18 = vmul.f32 %v451_v1, %v451_v1 }
 0x145   : > { %v529_v3 = vrot.slane %v528_v0, 2  ;;  %v442_v4 = vpop.f32.mrf.mxu1 }
 0x146   : > { %v514_v5 = vadd.f32 %v513_v2, %v512_v62  ;;  %v491_v7 = vmul.f32 %v442_v4, %v442_v4 }
 0x147   : > { %v530_v9 = vadd.f32 %v529_v3, %v528_v0 }
 0x148   : > { %v515_v10 = vrot.slane %v514_v5, 1  ;;  %v503_v11 = vadd.f32 %v491_v7, %v490_v6 }
 0x149   : > { %v531_v12 = vrot.slane %v530_v9, 1 }
 0x14a   : > { %v516_v13 = vadd.f32 %v515_v10, %v514_v5  ;;  %v504_v14 = vrot.slane %v503_v11, 4 }
 0x14b   : > { %v532_v16 = vadd.f32 %v531_v12, %v530_v9  ;;  %v454_v17 = vpop.f32.mrf.mxu2 }
 0x14c   : > { %v505_v19 = vadd.f32 %v504_v14, %v503_v11  ;;  %v495_v20 = vmul.f32 %v454_v17, %v454_v17 }
 0x14d   : > { %v533_v21 = vsub.f32 %v502_v15, %v532_v16  ;;  %v535_v22 = vsub.f32 %v516_v13, %v532_v16 }
 0x14e   : > { %v506_v23 = vrot.slane %v505_v19, 2  ;;  %v517_v24 = vadd.f32 %v495_v20, %v494_v18 }
 0x14f   : > { %v537_v25 = vadd.f32 1.0, %v533_v21  ;;  %v539_v26 = vadd.f32 1.0, %v535_v22 }
 0x150   : > { %v507_v27 = vadd.f32 %v506_v23, %v505_v19  ;;  %v518_v28 = vrot.slane %v517_v24, 4 }
 0x151   : > { %v1027_v29 = vmax.f32 %v537_v25, 0.0  ;;  %v1029_v30 = vmax.f32 %v539_v26, 0.0  ;;  %v617_v54 = vrot.slane %v539_v26, 6 }
 0x152   : > { %v508_v31 = vrot.slane %v507_v27, 1  ;;  %v519_v32 = vadd.f32 %v518_v28, %v517_v24 }
 0x153   : > { %788 = vrsqrt.f32 %v1027_v29  ;;  %vm576_vm8 = vcmp.eq.f32.partialorder %v1029_v30, inf  ;;  %vm552_vm9 = vcmp.eq.f32.partialorder %v1027_v29, inf  ;;  %v579_v18 = vand.u32 2147483648, %v1029_v30 }
 0x154   : > { %v509_v33 = vadd.f32 %v508_v31, %v507_v27  ;;  %v520_v34 = vrot.slane %v519_v32, 2  ;;  %790 = vrsqrt.f32 %v1029_v30  ;;  %v555_v21 = vand.u32 2147483648, %v1027_v29 }
 0x155   : > { %vm578_vm10 = vcmp.eq.f32.partialorder %v1029_v30, 0.0  ;;  %vm554_vm11 = vcmp.eq.f32.partialorder %v1027_v29, 0.0 }
 0x156   : > { %v534_v35 = vsub.f32 %v509_v33, %v532_v16  ;;  %v521_v36 = vadd.f32 %v520_v34, %v519_v32 }
 0x158   : > { %v538_v37 = vadd.f32 1.0, %v534_v35  ;;  %v522_v38 = vrot.slane %v521_v36, 1 }
 0x159   : > { %v789_v39 = vpop.eup %788 }
 0x15a   : > { %v791_v40 = vpop.eup %790  ;;  %v542_v41 = vmax.f32 %v538_v37, 0.0  ;;  %v523_v42 = vadd.f32 %v522_v38, %v521_v36  ;;  %v546_v43 = vmul.f32 %v789_v39, %v1027_v29  ;;  %v615_v44 = vrot.slane %v538_v37, 7 }
 0x15b   : > { %v570_v45 = vmul.f32 %v791_v40, %v1029_v30 }
 0x15c   : > { %792 = vrsqrt.f32 %v542_v41  ;;  %v536_v46 = vsub.f32 %v523_v42, %v532_v16  ;;  %v547_v47 = vmul.f32 %v789_v39, %v546_v43  ;;  %v616_v50 = vsel %vm599_vm3, %v615_v44, %v537_v25 }
 0x15d   : > { %v571_v48 = vmul.f32 %v791_v40, %v570_v45  ;;  %v618_v57 = vsel %vm602_vm4, %v617_v54, %v616_v50  ;;  %vm564_vm6 = vcmp.eq.f32.partialorder %v542_v41, inf  ;;  %v567_v12 = vand.u32 2147483648, %v542_v41 }
 0x15e   : > { %v540_v49 = vadd.f32 1.0, %v536_v46  ;;  %v548_v55 = vmul.f32 0.5, %v547_v47  ;;  %vm566_vm7 = vcmp.eq.f32.partialorder %v542_v41, 0.0 }
 0x15f   : > { %v572_v53 = vmul.f32 0.5, %v571_v48 }
 0x160   : > { %v544_v51 = vmax.f32 %v540_v49, 0.0  ;;  %v619_v52 = vrot.slane %v540_v49, 5  ;;  %v549_v62 = vsub.f32 1.5, %v548_v55 }
 0x161   : > { %v573_v61 = vsub.f32 1.5, %v572_v53 }
 0x162   : > { %v793_v56 = vpop.eup %792  ;;  %794 = vrsqrt.f32 %v544_v51  ;;  %v620_v59 = vsel %vm605_vm5, %v619_v52, %v618_v57  ;;  %v550_v3 = vmul.f32 %v789_v39, %v549_v62  ;;  %vm588_vm12 = vcmp.eq.f32.partialorder %v544_v51, inf }
 0x163   : > { %v558_v58 = vmul.f32 %v793_v56, %v542_v41  ;;  %622 = vst [vmem:[%s1023_s9 + $0x4] sm:$0xf] %v620_v59  ;;  %v574_v2 = vmul.f32 %v791_v40, %v573_v61  ;;  %v591_v25 = vand.u32 2147483648, %v544_v51  ;;  %vm590_vm13 = vcmp.eq.f32.partialorder %v544_v51, 0.0 }
 0x164   : > { %v551_v9 = vmul.f32 %v550_v3, %v1027_v29 }
 0x165   : > { %v559_v63 = vmul.f32 %v793_v56, %v558_v58  ;;  %v575_v8 = vmul.f32 %v574_v2, %v1029_v30 }
 0x166   : > { %v553_v17 = vsel %vm552_vm9, %v1027_v29, %v551_v9 }
 0x167   : > { %v560_v0 = vmul.f32 0.5, %v559_v63  ;;  %v577_v16 = vsel %vm576_vm8, %v1029_v30, %v575_v8  ;;  %v556_v24 = vsel %vm554_vm11, %v555_v21, %v553_v17  ;;  %v593_v30 = vld [vmem:[%s290_s18] sm:$0xf] }
 0x168   : > { %v795_v1 = vpop.eup %794  ;;  %v580_v22 = vsel %vm578_vm10, %v579_v18, %v577_v16 }
 0x169   : > { %v561_v4 = vsub.f32 1.5, %v560_v0  ;;  %v582_v5 = vmul.f32 %v795_v1, %v544_v51  ;;  %v601_v29 = vrot.slane %v580_v22, 6 }
 0x16b   : > { %v562_v6 = vmul.f32 %v793_v56, %v561_v4  ;;  %v583_v7 = vmul.f32 %v795_v1, %v582_v5 }
 0x16d   : > { %v563_v10 = vmul.f32 %v562_v6, %v542_v41  ;;  %v584_v11 = vmul.f32 0.5, %v583_v7 }
 0x16f   : > { %v565_v13 = vsel %vm564_vm6, %v542_v41, %v563_v10  ;;  %v585_v14 = vsub.f32 1.5, %v584_v11 }
 0x170   : > { %v568_v15 = vsel %vm566_vm7, %v567_v12, %v565_v13 }
 0x171   : > { %v586_v19 = vmul.f32 %v795_v1, %v585_v14  ;;  %v598_v20 = vrot.slane %v568_v15, 7 }
 0x173   : > { %v587_v23 = vmul.f32 %v586_v19, %v544_v51  ;;  %v600_v27 = vsel %vm599_vm3, %v598_v20, %v556_v24 }
 0x174   : > { %v603_v32 = vsel %vm602_vm4, %v601_v29, %v600_v27 }
 0x175   : > { %v589_v26 = vsel %vm588_vm12, %v544_v51, %v587_v23 }
 0x176   : > { %v592_v28 = vsel %vm590_vm13, %v591_v25, %v589_v26 }
 0x177   : > { %v604_v31 = vrot.slane %v592_v28, 5 }
 0x179   : > { %v606_v33 = vsel %vm605_vm5, %v604_v31, %v603_v32 }
 0x17a   : > { %v608_v34 = vmul.f32 %v606_v33, %v593_v30 }
 0x17c   : > { %v609_v35 = vadd.f32 %v608_v34, %v1021_v60 }
 0x17e   : > { %623 = vst [vmem:[%s1023_s9 + $0x8] sm:$0xf] %v609_v35 }
 0x17f   : > { %823 = shalt.err (!%p820_p3)
}
 0x180   : > { %s861_s29 = smov 128   ;;  %s862_s9 = smov 256  }
 0x181   : > { %s863_s19 = smov 8  }
 0x182   : > { %740 = dma.vmem_to_hbm [thread:$0]  (%p942_p5), %s637_s15, 256, %s639_s16, %s625_s21, %s861_s29, %s862_s9, %s863_s19  }
 0x183 PF: > { %p746_p4 = scmp.ge.s32.totalorder %s858_s27, 2  ;;  %s653_s20 = sand.u32 1, %s846_s24  }
 0x184   : > { %s654_s28 = scalar_lea.sflag [#allocation3], %s653_s20 }
 0x185   : > { %p743_p7 = pnand %p746_p4, %p946_p6 }
 0x187   : > { %p744_p8 = pneg %p743_p7 }
 0x189   : > { %841 = dma.done.wait (%p744_p8), %s654_s28, 256  }
 0x18a   : > { %843 = vsyncadd (%p744_p8), %s654_s28, 4294967040  ;;  %p17_p9 = scmp.ge.s32.totalorder %s929_s30, 4   ;;  %s1103_s24 = smov %s850_s25 }
 0x18b   : > { %s1104_s25 = smov %s854_s26  ;;  %s1105_s26 = smov %s940_s10 }
 0x18c   : > { %s1106_s27 = smov %s929_s30  ;;  %19 = sbr.rel (!%p17_p9) target bundleno = 3 (0x3), region = 86 }
 0x191   :  { %660 = vsyncpa [#allocation3], 1 }
 0x192   :  { %662 = vsyncpa [#allocation3 + $0x1], 1 }

</bundles_post_ra>
